<compile_context>
chip_gen: v7x
topology: tpu7x:2x2x1
jax: 0.10.0
libtpu: 0.0.40
codegen_flags: <defaults>
</compile_context>

<pallas_src>
import functools
import math

import jax
import jax.numpy as jnp
from jax.experimental import pallas as pl
from jax.experimental.pallas import tpu as pltpu

LANES = 128


def _vmem_capacity_bytes():
    try:
        return int(pltpu.get_tpu_info().vmem_capacity_bytes)
    except Exception:
        return 64 << 20            # conservative fallback (v7x per-TC VMEM)


def _divisors_desc(n):
    return [d for d in range(n, 0, -1) if n % d == 0]


def _choose_row_chunk(rows, target):
    """Row-chunk that is (8,128)-legal: full extent, a large multiple-of-8
    divisor, or a multiple-of-8 chunk with a masked tail."""
    if rows <= target:
        return rows                              # full extent is always legal
    # Prefer an exact divisor, but only if it stays reasonably large.
    for cand in range(target, max(7, target // 2 - 1), -1):
        if rows % cand == 0 and cand % 8 == 0:
            return cand
    # No friendly divisor: multiple-of-8 chunk + in-kernel masked tail.
    return max(8, target - (target % 8))


def _select_tiling(rows, iteration, pred_isz, gt_isz, usable_bytes,
                   max_row_chunk=None):
    """Pick (row_chunk, iterations_per_step) maximising per-step volume while
    keeping the double-buffered footprint under `usable_bytes`."""
    def footprint(chunk, ti):
        # x2 for double buffering: 2 pred streams + 2 GT streams + tiny output.
        return 2 * (2 * ti * chunk * LANES * pred_isz
                    + 2 * chunk * LANES * gt_isz
                    + ti * LANES * 4)

    targets = [4096, 2048, 1024, 512, 256, 128, 64, 32, 16, 8]
    if max_row_chunk is not None:
        targets = [t for t in targets if t <= max_row_chunk] or [max(8, max_row_chunk)]
    for target in targets:
        chunk = _choose_row_chunk(rows, target)
        for ti in _divisors_desc(iteration):
            if footprint(chunk, ti) <= usable_bytes:
                return chunk, ti
    return _choose_row_chunk(rows, 8), 1


def _iter_focal_kernel(sp_ref, tp_ref, sg_ref, tg_ref, out_ref, *,
                       gamma, iters_in_block, chunk, valid_rows,
                       needs_tail_mask):
    """One grid step: row-chunk r (outer, parallel), iteration-block ib (inner).

    sp_ref/tp_ref: (iters_in_block, chunk, 128) prediction tiles (probabilities).
    sg_ref/tg_ref: (chunk, 128) ground-truth mask tiles (binary).
    out_ref:       (1, 1, iters_in_block, 128) lane-dense per-(chunk,iteration)
                   partial sums; fully reduced in the wrapper.
    """
    t_s = sg_ref[...].astype(jnp.float32)
    t_t = tg_ref[...].astype(jnp.float32)
    # Hoisted out of the folded-iteration loop (loop-invariant per GT tile).
    is_one_s = (t_s == 1.0)
    is_one_t = (t_t == 1.0)

    if needs_tail_mask:
        r = pl.program_id(0)
        row_ids = jax.lax.broadcasted_iota(jnp.int32, (chunk, LANES), 0)
        valid = (r * chunk + row_ids) < valid_rows
    else:
        valid = None

    gi = int(gamma)
    gamma_is_small_int = (float(gamma) == float(gi)) and (0 <= gi <= 8)

    def focal_lane_partial(p, is_one):
        # Binary-target fast path (masks are 0/1): p_t = p if t==1 else 1-p.
        # TODO(synk): soft (non-binary) targets would need the full
        #             t*log(p) + (1-t)*log1p(-p) BCE form.
        q = jnp.where(is_one, p, 1.0 - p)
        bce = -jnp.maximum(jnp.log(q), -100.0)   # PyTorch BCE -100 clamp
        one_m_pt = 1.0 - q                       # == 1 - exp(-bce) up to the clamp
        if gamma_is_small_int:
            w = None
            for _ in range(gi):                  # gamma=2 -> two VALU multiplies
                w = one_m_pt if w is None else w * one_m_pt
            fl = bce if w is None else w * bce
        else:
            fl = (one_m_pt ** gamma) * bce
        if valid is not None:
            fl = jnp.where(valid, fl, 0.0)       # mask the padded tail rows
        return jnp.sum(fl, axis=0, keepdims=True)   # sublane-only reduce -> (1,128)

    parts = []
    for j in range(iters_in_block):              # static unroll
        p_s = sp_ref[j].astype(jnp.float32)
        p_t = tp_ref[j].astype(jnp.float32)
        parts.append(focal_lane_partial(p_s, is_one_s)
                     + focal_lane_partial(p_t, is_one_t))
    out_ref[0, 0] = jnp.concatenate(parts, axis=0)   # one (ti,128) lane-dense store


def iterative_focal_loss(source_mask_pred, template_mask_pred,
                         source_mask_gt, template_mask_gt,
                         *, iteration=8, discount_factor=0.5,
                         alpha=1.0, gamma=2.0, max_row_chunk=None):
    """Predictions may be bf16 and GT masks bool/int8/bf16 (cast happens on the
    VMEM tile inside the kernel); narrower inputs directly cut HBM traffic."""
    assert source_mask_pred.shape[0] == iteration
    assert template_mask_pred.shape[0] == iteration
    assert source_mask_gt.shape == template_mask_gt.shape
    assert source_mask_pred.shape[1:] == source_mask_gt.shape
    assert template_mask_pred.shape[1:] == template_mask_gt.shape

    n_elem = math.prod(source_mask_gt.shape)
    # TODO(synk): zero-pad + mask-aware mean for mask sizes not divisible by 128.
    assert n_elem % LANES == 0, "flattened mask size must be lane-aligned (x128)"
    rows = n_elem // LANES

    # No wrapper-side astype (avoids a full extra HBM copy); the f32 cast
    # happens on the VMEM tiles in-kernel.
    sp = source_mask_pred.reshape(iteration, rows, LANES)
    tp = template_mask_pred.reshape(iteration, rows, LANES)
    sg = source_mask_gt.reshape(rows, LANES)
    tg = template_mask_gt.reshape(rows, LANES)

    pred_isz = max(jnp.dtype(sp.dtype).itemsize, jnp.dtype(tp.dtype).itemsize)
    gt_isz = max(jnp.dtype(sg.dtype).itemsize, jnp.dtype(tg.dtype).itemsize)

    vmem_cap = _vmem_capacity_bytes()
    usable = min(int(vmem_cap * 0.65), 80 << 20)   # ~42 MiB on v7x, 80 MiB on v5e/v6e
    chunk, ti = _select_tiling(rows, iteration, pred_isz, gt_isz, usable,
                               max_row_chunk=max_row_chunk)
    n_chunks = pl.cdiv(rows, chunk)
    n_iter_blocks = iteration // ti
    needs_tail_mask = (rows % chunk) != 0

    per_step = (2 * ti * chunk * LANES * pred_isz
                + 2 * chunk * LANES * gt_isz
                + ti * LANES * 4)
    vmem_limit = int(min(vmem_cap, max(32 << 20, 2 * per_step + (8 << 20))))

    kernel = functools.partial(_iter_focal_kernel, gamma=gamma,
                               iters_in_block=ti, chunk=chunk,
                               valid_rows=rows,
                               needs_tail_mask=needs_tail_mask)

    # Grid: row chunks outer (parallel -> shards across TCs on v7x), iteration
    # blocks inner (GT tiles stay resident across them).  Every grid step
    # writes its own output block, so there is no cross-step accumulation and
    # no ordering requirement on the row axis.
    partials = pl.pallas_call(
        kernel,
        out_shape=jax.ShapeDtypeStruct((n_chunks, n_iter_blocks, ti, LANES),
                                       jnp.float32),
        grid=(n_chunks, n_iter_blocks),
        in_specs=[
            pl.BlockSpec((ti, chunk, LANES), lambda r, ib: (ib, r, 0)),  # source pred
            pl.BlockSpec((ti, chunk, LANES), lambda r, ib: (ib, r, 0)),  # template pred
            pl.BlockSpec((chunk, LANES), lambda r, ib: (r, 0)),          # source gt
            pl.BlockSpec((chunk, LANES), lambda r, ib: (r, 0)),          # template gt
        ],
        out_specs=pl.BlockSpec((1, 1, ti, LANES), lambda r, ib: (r, ib, 0, 0)),
        compiler_params=pltpu.CompilerParams(
            dimension_semantics=("parallel", "arbitrary"),
            vmem_limit_bytes=vmem_limit),
    )(sp, tp, sg, tg)

    # Tiny wrapper-side reduction over chunks and lanes, with alpha and the
    # per-mask 1/N folded into the discount weights.
    per_iter_sums = partials.reshape(n_chunks, iteration, LANES).sum(axis=(0, 2))
    weights = (alpha / float(n_elem)) * (
        discount_factor
        ** (iteration - jnp.arange(iteration, dtype=jnp.float32)))
    return {"loss": jnp.sum(weights * per_iter_sums)}


def _reference(source_mask_pred, template_mask_pred, source_mask_gt,
               template_mask_gt, *, iteration=8, discount_factor=0.5,
               alpha=1.0, gamma=2.0):
    # Faithful transcription of the PyTorch module (BCE -100 clamp, exp(-bce),
    # float pow) used to validate the optimised kernel math.
    def focal(p, t):
        p = p.astype(jnp.float32)
        t = t.astype(jnp.float32)
        logp = jnp.maximum(jnp.log(p), -100.0)
        log1mp = jnp.maximum(jnp.log1p(-p), -100.0)
        bce = -(t * logp + (1.0 - t) * log1mp)
        pt = jnp.exp(-bce)
        return jnp.mean(alpha * (1.0 - pt) ** gamma * bce)

    total = 0.0
    for i in range(iteration):
        ls = focal(source_mask_pred[i], source_mask_gt)
        lt = focal(template_mask_pred[i], template_mask_gt)
        total = total + discount_factor ** (iteration - i) * (ls + lt)
    return total


if __name__ == "__main__":
    key = jax.random.PRNGKey(0)
    k1, k2, k3, k4 = jax.random.split(key, 4)

    ITER = 8
    B, C, H, W = 2, 1, 16, 16  # NCHW masks; per-iteration preds stacked on axis 0

    # Predictions are probabilities (FocalLoss used with logits=False).
    source_mask_pred = jax.nn.sigmoid(
        jax.random.normal(k1, (ITER, B, C, H, W), dtype=jnp.float32))
    template_mask_pred = jax.nn.sigmoid(
        jax.random.normal(k2, (ITER, B, C, H, W), dtype=jnp.float32))
    source_mask_gt = jax.random.bernoulli(k3, 0.5, (B, C, H, W)).astype(jnp.float32)
    template_mask_gt = jax.random.bernoulli(k4, 0.5, (B, C, H, W)).astype(jnp.float32)

    # --- base case ---
    out = iterative_focal_loss(source_mask_pred, template_mask_pred,
                               source_mask_gt, template_mask_gt,
                               iteration=ITER, discount_factor=0.5,
                               alpha=1.0, gamma=2.0)
    loss = jax.block_until_ready(out["loss"])
    ref = _reference(source_mask_pred, template_mask_pred,
                     source_mask_gt, template_mask_gt,
                     iteration=ITER, discount_factor=0.5, alpha=1.0, gamma=2.0)
    assert jnp.allclose(loss, ref, rtol=1e-4, atol=1e-6), (loss, ref)

    # --- bf16 predictions (halved pred DMA); kernel casts to f32 on the tile ---
    sp_bf = source_mask_pred.astype(jnp.bfloat16)
    tp_bf = template_mask_pred.astype(jnp.bfloat16)
    out_bf = iterative_focal_loss(sp_bf, tp_bf, source_mask_gt, template_mask_gt,
                                  iteration=ITER)
    loss_bf = jax.block_until_ready(out_bf["loss"])
    ref_bf = _reference(sp_bf, tp_bf, source_mask_gt, template_mask_gt,
                        iteration=ITER)
    assert jnp.allclose(loss_bf, ref_bf, rtol=1e-4, atol=1e-6), (loss_bf, ref_bf)

    # --- multi-chunk path with a masked tail (rows=20, forced chunk=16) ---
    k5, k6, k7, k8 = jax.random.split(jax.random.PRNGKey(1), 4)
    B2, C2, H2, W2 = 1, 1, 20, 128
    sp2 = jax.nn.sigmoid(jax.random.normal(k5, (ITER, B2, C2, H2, W2), jnp.float32))
    tp2 = jax.nn.sigmoid(jax.random.normal(k6, (ITER, B2, C2, H2, W2), jnp.float32))
    sg2 = jax.random.bernoulli(k7, 0.5, (B2, C2, H2, W2)).astype(jnp.float32)
    tg2 = jax.random.bernoulli(k8, 0.5, (B2, C2, H2, W2)).astype(jnp.float32)
    out2 = iterative_focal_loss(sp2, tp2, sg2, tg2, iteration=ITER,
                                max_row_chunk=16)
    loss2 = jax.block_until_ready(out2["loss"])
    ref2 = _reference(sp2, tp2, sg2, tg2, iteration=ITER)
    assert jnp.allclose(loss2, ref2, rtol=1e-4, atol=1e-6), (loss2, ref2)

    print("KERNEL_OK")
</pallas_src>

<mosaic_0001>
module attributes {stable_mosaic.version = 11 : i64} {
  func.func @_iter_focal_kernel(%arg0: i32, %arg1: i32, %arg2: memref<8x4x128xf32, #tpu.memory_space<vmem>>, %arg3: memref<8x4x128xf32, #tpu.memory_space<vmem>>, %arg4: memref<4x128xf32, #tpu.memory_space<vmem>>, %arg5: memref<4x128xf32, #tpu.memory_space<vmem>>, %arg6: memref<1x1x8x128xf32, #tpu.memory_space<vmem>>) attributes {dimension_semantics = [#tpu.dimension_semantics<parallel>, #tpu.dimension_semantics<arbitrary>], iteration_bounds = array<i64: 1, 1>, scalar_prefetch = 0 : i64, scratch_operands = 0 : i64, tpu.core_type = #tpu.core_type<tc>, window_params = [{transform_indices = @transform_0, window_bounds = array<i64: 8, 4, 128>}, {transform_indices = @transform_1, window_bounds = array<i64: 8, 4, 128>}, {transform_indices = @transform_2, window_bounds = array<i64: 4, 128>}, {transform_indices = @transform_3, window_bounds = array<i64: 4, 128>}, {transform_indices = @transform_4, window_bounds = array<i64: 1, 1, 8, 128>}]} {
    %c0 = arith.constant 0 : index
    %c0_0 = arith.constant 0 : index
    %0 = vector.load %arg4[%c0, %c0_0] : memref<4x128xf32, #tpu.memory_space<vmem>>, vector<4x128xf32>
    %c0_1 = arith.constant 0 : index
    %c0_2 = arith.constant 0 : index
    %1 = vector.load %arg5[%c0_1, %c0_2] : memref<4x128xf32, #tpu.memory_space<vmem>>, vector<4x128xf32>
    %cst = arith.constant 1.000000e+00 : f32
    %2 = vector.broadcast %cst : f32 to vector<4x128xf32>
    %3 = arith.cmpf oeq, %0, %2 : vector<4x128xf32>
    %cst_3 = arith.constant 1.000000e+00 : f32
    %4 = vector.broadcast %cst_3 : f32 to vector<4x128xf32>
    %5 = arith.cmpf oeq, %1, %4 : vector<4x128xf32>
    %c0_4 = arith.constant 0 : index
    %c0_5 = arith.constant 0 : index
    %c0_6 = arith.constant 0 : index
    %6 = vector.load %arg2[%c0_4, %c0_5, %c0_6] : memref<8x4x128xf32, #tpu.memory_space<vmem>>, vector<1x4x128xf32>
    %7 = vector.shape_cast %6 : vector<1x4x128xf32> to vector<4x128xf32>
    %c0_7 = arith.constant 0 : index
    %c0_8 = arith.constant 0 : index
    %c0_9 = arith.constant 0 : index
    %8 = vector.load %arg3[%c0_7, %c0_8, %c0_9] : memref<8x4x128xf32, #tpu.memory_space<vmem>>, vector<1x4x128xf32>
    %9 = vector.shape_cast %8 : vector<1x4x128xf32> to vector<4x128xf32>
    %cst_10 = arith.constant 1.000000e+00 : f32
    %10 = vector.broadcast %cst_10 : f32 to vector<4x128xf32>
    %11 = arith.subf %10, %7 : vector<4x128xf32>
    %12 = arith.select %3, %7, %11 : vector<4x128xi1>, vector<4x128xf32>
    %13 = math.log %12 : vector<4x128xf32>
    %cst_11 = arith.constant -1.000000e+02 : f32
    %14 = vector.broadcast %cst_11 : f32 to vector<4x128xf32>
    %15 = arith.maximumf %13, %14 : vector<4x128xf32>
    %cst_12 = arith.constant 0.000000e+00 : f32
    %16 = vector.broadcast %cst_12 : f32 to vector<4x128xf32>
    %17 = arith.subf %16, %15 : vector<4x128xf32>
    %cst_13 = arith.constant 1.000000e+00 : f32
    %18 = vector.broadcast %cst_13 : f32 to vector<4x128xf32>
    %19 = arith.subf %18, %12 : vector<4x128xf32>
    %20 = arith.mulf %19, %19 : vector<4x128xf32>
    %21 = arith.mulf %20, %17 : vector<4x128xf32>
    %cst_14 = arith.constant dense<0.000000e+00> : vector<128xf32>
    %22 = vector.multi_reduction <add>, %21, %cst_14 [0] : vector<4x128xf32> to vector<128xf32>
    %23 = vector.shape_cast %22 : vector<128xf32> to vector<1x128xf32>
    %cst_15 = arith.constant 1.000000e+00 : f32
    %24 = vector.broadcast %cst_15 : f32 to vector<4x128xf32>
    %25 = arith.subf %24, %9 : vector<4x128xf32>
    %26 = arith.select %5, %9, %25 : vector<4x128xi1>, vector<4x128xf32>
    %27 = math.log %26 : vector<4x128xf32>
    %cst_16 = arith.constant -1.000000e+02 : f32
    %28 = vector.broadcast %cst_16 : f32 to vector<4x128xf32>
    %29 = arith.maximumf %27, %28 : vector<4x128xf32>
    %cst_17 = arith.constant 0.000000e+00 : f32
    %30 = vector.broadcast %cst_17 : f32 to vector<4x128xf32>
    %31 = arith.subf %30, %29 : vector<4x128xf32>
    %cst_18 = arith.constant 1.000000e+00 : f32
    %32 = vector.broadcast %cst_18 : f32 to vector<4x128xf32>
    %33 = arith.subf %32, %26 : vector<4x128xf32>
    %34 = arith.mulf %33, %33 : vector<4x128xf32>
    %35 = arith.mulf %34, %31 : vector<4x128xf32>
    %cst_19 = arith.constant dense<0.000000e+00> : vector<128xf32>
    %36 = vector.multi_reduction <add>, %35, %cst_19 [0] : vector<4x128xf32> to vector<128xf32>
    %37 = vector.shape_cast %36 : vector<128xf32> to vector<1x128xf32>
    %38 = arith.addf %23, %37 : vector<1x128xf32>
    %c1 = arith.constant 1 : index
    %c0_20 = arith.constant 0 : index
    %c0_21 = arith.constant 0 : index
    %39 = vector.load %arg2[%c1, %c0_20, %c0_21] : memref<8x4x128xf32, #tpu.memory_space<vmem>>, vector<1x4x128xf32>
    %40 = vector.shape_cast %39 : vector<1x4x128xf32> to vector<4x128xf32>
    %c1_22 = arith.constant 1 : index
    %c0_23 = arith.constant 0 : index
    %c0_24 = arith.constant 0 : index
    %41 = vector.load %arg3[%c1_22, %c0_23, %c0_24] : memref<8x4x128xf32, #tpu.memory_space<vmem>>, vector<1x4x128xf32>
    %42 = vector.shape_cast %41 : vector<1x4x128xf32> to vector<4x128xf32>
    %cst_25 = arith.constant 1.000000e+00 : f32
    %43 = vector.broadcast %cst_25 : f32 to vector<4x128xf32>
    %44 = arith.subf %43, %40 : vector<4x128xf32>
    %45 = arith.select %3, %40, %44 : vector<4x128xi1>, vector<4x128xf32>
    %46 = math.log %45 : vector<4x128xf32>
    %cst_26 = arith.constant -1.000000e+02 : f32
    %47 = vector.broadcast %cst_26 : f32 to vector<4x128xf32>
    %48 = arith.maximumf %46, %47 : vector<4x128xf32>
    %cst_27 = arith.constant 0.000000e+00 : f32
    %49 = vector.broadcast %cst_27 : f32 to vector<4x128xf32>
    %50 = arith.subf %49, %48 : vector<4x128xf32>
    %cst_28 = arith.constant 1.000000e+00 : f32
    %51 = vector.broadcast %cst_28 : f32 to vector<4x128xf32>
    %52 = arith.subf %51, %45 : vector<4x128xf32>
    %53 = arith.mulf %52, %52 : vector<4x128xf32>
    %54 = arith.mulf %53, %50 : vector<4x128xf32>
    %cst_29 = arith.constant dense<0.000000e+00> : vector<128xf32>
    %55 = vector.multi_reduction <add>, %54, %cst_29 [0] : vector<4x128xf32> to vector<128xf32>
    %56 = vector.shape_cast %55 : vector<128xf32> to vector<1x128xf32>
    %cst_30 = arith.constant 1.000000e+00 : f32
    %57 = vector.broadcast %cst_30 : f32 to vector<4x128xf32>
    %58 = arith.subf %57, %42 : vector<4x128xf32>
    %59 = arith.select %5, %42, %58 : vector<4x128xi1>, vector<4x128xf32>
    %60 = math.log %59 : vector<4x128xf32>
    %cst_31 = arith.constant -1.000000e+02 : f32
    %61 = vector.broadcast %cst_31 : f32 to vector<4x128xf32>
    %62 = arith.maximumf %60, %61 : vector<4x128xf32>
    %cst_32 = arith.constant 0.000000e+00 : f32
    %63 = vector.broadcast %cst_32 : f32 to vector<4x128xf32>
    %64 = arith.subf %63, %62 : vector<4x128xf32>
    %cst_33 = arith.constant 1.000000e+00 : f32
    %65 = vector.broadcast %cst_33 : f32 to vector<4x128xf32>
    %66 = arith.subf %65, %59 : vector<4x128xf32>
    %67 = arith.mulf %66, %66 : vector<4x128xf32>
    %68 = arith.mulf %67, %64 : vector<4x128xf32>
    %cst_34 = arith.constant dense<0.000000e+00> : vector<128xf32>
    %69 = vector.multi_reduction <add>, %68, %cst_34 [0] : vector<4x128xf32> to vector<128xf32>
    %70 = vector.shape_cast %69 : vector<128xf32> to vector<1x128xf32>
    %71 = arith.addf %56, %70 : vector<1x128xf32>
    %c2 = arith.constant 2 : index
    %c0_35 = arith.constant 0 : index
    %c0_36 = arith.constant 0 : index
    %72 = vector.load %arg2[%c2, %c0_35, %c0_36] : memref<8x4x128xf32, #tpu.memory_space<vmem>>, vector<1x4x128xf32>
    %73 = vector.shape_cast %72 : vector<1x4x128xf32> to vector<4x128xf32>
    %c2_37 = arith.constant 2 : index
    %c0_38 = arith.constant 0 : index
    %c0_39 = arith.constant 0 : index
    %74 = vector.load %arg3[%c2_37, %c0_38, %c0_39] : memref<8x4x128xf32, #tpu.memory_space<vmem>>, vector<1x4x128xf32>
    %75 = vector.shape_cast %74 : vector<1x4x128xf32> to vector<4x128xf32>
    %cst_40 = arith.constant 1.000000e+00 : f32
    %76 = vector.broadcast %cst_40 : f32 to vector<4x128xf32>
    %77 = arith.subf %76, %73 : vector<4x128xf32>
    %78 = arith.select %3, %73, %77 : vector<4x128xi1>, vector<4x128xf32>
    %79 = math.log %78 : vector<4x128xf32>
    %cst_41 = arith.constant -1.000000e+02 : f32
    %80 = vector.broadcast %cst_41 : f32 to vector<4x128xf32>
    %81 = arith.maximumf %79, %80 : vector<4x128xf32>
    %cst_42 = arith.constant 0.000000e+00 : f32
    %82 = vector.broadcast %cst_42 : f32 to vector<4x128xf32>
    %83 = arith.subf %82, %81 : vector<4x128xf32>
    %cst_43 = arith.constant 1.000000e+00 : f32
    %84 = vector.broadcast %cst_43 : f32 to vector<4x128xf32>
    %85 = arith.subf %84, %78 : vector<4x128xf32>
    %86 = arith.mulf %85, %85 : vector<4x128xf32>
    %87 = arith.mulf %86, %83 : vector<4x128xf32>
    %cst_44 = arith.constant dense<0.000000e+00> : vector<128xf32>
    %88 = vector.multi_reduction <add>, %87, %cst_44 [0] : vector<4x128xf32> to vector<128xf32>
    %89 = vector.shape_cast %88 : vector<128xf32> to vector<1x128xf32>
    %cst_45 = arith.constant 1.000000e+00 : f32
    %90 = vector.broadcast %cst_45 : f32 to vector<4x128xf32>
    %91 = arith.subf %90, %75 : vector<4x128xf32>
    %92 = arith.select %5, %75, %91 : vector<4x128xi1>, vector<4x128xf32>
    %93 = math.log %92 : vector<4x128xf32>
    %cst_46 = arith.constant -1.000000e+02 : f32
    %94 = vector.broadcast %cst_46 : f32 to vector<4x128xf32>
    %95 = arith.maximumf %93, %94 : vector<4x128xf32>
    %cst_47 = arith.constant 0.000000e+00 : f32
    %96 = vector.broadcast %cst_47 : f32 to vector<4x128xf32>
    %97 = arith.subf %96, %95 : vector<4x128xf32>
    %cst_48 = arith.constant 1.000000e+00 : f32
    %98 = vector.broadcast %cst_48 : f32 to vector<4x128xf32>
    %99 = arith.subf %98, %92 : vector<4x128xf32>
    %100 = arith.mulf %99, %99 : vector<4x128xf32>
    %101 = arith.mulf %100, %97 : vector<4x128xf32>
    %cst_49 = arith.constant dense<0.000000e+00> : vector<128xf32>
    %102 = vector.multi_reduction <add>, %101, %cst_49 [0] : vector<4x128xf32> to vector<128xf32>
    %103 = vector.shape_cast %102 : vector<128xf32> to vector<1x128xf32>
    %104 = arith.addf %89, %103 : vector<1x128xf32>
    %c3 = arith.constant 3 : index
    %c0_50 = arith.constant 0 : index
    %c0_51 = arith.constant 0 : index
    %105 = vector.load %arg2[%c3, %c0_50, %c0_51] : memref<8x4x128xf32, #tpu.memory_space<vmem>>, vector<1x4x128xf32>
    %106 = vector.shape_cast %105 : vector<1x4x128xf32> to vector<4x128xf32>
    %c3_52 = arith.constant 3 : index
    %c0_53 = arith.constant 0 : index
    %c0_54 = arith.constant 0 : index
    %107 = vector.load %arg3[%c3_52, %c0_53, %c0_54] : memref<8x4x128xf32, #tpu.memory_space<vmem>>, vector<1x4x128xf32>
    %108 = vector.shape_cast %107 : vector<1x4x128xf32> to vector<4x128xf32>
    %cst_55 = arith.constant 1.000000e+00 : f32
    %109 = vector.broadcast %cst_55 : f32 to vector<4x128xf32>
    %110 = arith.subf %109, %106 : vector<4x128xf32>
    %111 = arith.select %3, %106, %110 : vector<4x128xi1>, vector<4x128xf32>
    %112 = math.log %111 : vector<4x128xf32>
    %cst_56 = arith.constant -1.000000e+02 : f32
    %113 = vector.broadcast %cst_56 : f32 to vector<4x128xf32>
    %114 = arith.maximumf %112, %113 : vector<4x128xf32>
    %cst_57 = arith.constant 0.000000e+00 : f32
    %115 = vector.broadcast %cst_57 : f32 to vector<4x128xf32>
    %116 = arith.subf %115, %114 : vector<4x128xf32>
    %cst_58 = arith.constant 1.000000e+00 : f32
    %117 = vector.broadcast %cst_58 : f32 to vector<4x128xf32>
    %118 = arith.subf %117, %111 : vector<4x128xf32>
    %119 = arith.mulf %118, %118 : vector<4x128xf32>
    %120 = arith.mulf %119, %116 : vector<4x128xf32>
    %cst_59 = arith.constant dense<0.000000e+00> : vector<128xf32>
    %121 = vector.multi_reduction <add>, %120, %cst_59 [0] : vector<4x128xf32> to vector<128xf32>
    %122 = vector.shape_cast %121 : vector<128xf32> to vector<1x128xf32>
    %cst_60 = arith.constant 1.000000e+00 : f32
    %123 = vector.broadcast %cst_60 : f32 to vector<4x128xf32>
    %124 = arith.subf %123, %108 : vector<4x128xf32>
    %125 = arith.select %5, %108, %124 : vector<4x128xi1>, vector<4x128xf32>
    %126 = math.log %125 : vector<4x128xf32>
    %cst_61 = arith.constant -1.000000e+02 : f32
    %127 = vector.broadcast %cst_61 : f32 to vector<4x128xf32>
    %128 = arith.maximumf %126, %127 : vector<4x128xf32>
    %cst_62 = arith.constant 0.000000e+00 : f32
    %129 = vector.broadcast %cst_62 : f32 to vector<4x128xf32>
    %130 = arith.subf %129, %128 : vector<4x128xf32>
    %cst_63 = arith.constant 1.000000e+00 : f32
    %131 = vector.broadcast %cst_63 : f32 to vector<4x128xf32>
    %132 = arith.subf %131, %125 : vector<4x128xf32>
    %133 = arith.mulf %132, %132 : vector<4x128xf32>
    %134 = arith.mulf %133, %130 : vector<4x128xf32>
    %cst_64 = arith.constant dense<0.000000e+00> : vector<128xf32>
    %135 = vector.multi_reduction <add>, %134, %cst_64 [0] : vector<4x128xf32> to vector<128xf32>
    %136 = vector.shape_cast %135 : vector<128xf32> to vector<1x128xf32>
    %137 = arith.addf %122, %136 : vector<1x128xf32>
    %c4 = arith.constant 4 : index
    %c0_65 = arith.constant 0 : index
    %c0_66 = arith.constant 0 : index
    %138 = vector.load %arg2[%c4, %c0_65, %c0_66] : memref<8x4x128xf32, #tpu.memory_space<vmem>>, vector<1x4x128xf32>
    %139 = vector.shape_cast %138 : vector<1x4x128xf32> to vector<4x128xf32>
    %c4_67 = arith.constant 4 : index
    %c0_68 = arith.constant 0 : index
    %c0_69 = arith.constant 0 : index
    %140 = vector.load %arg3[%c4_67, %c0_68, %c0_69] : memref<8x4x128xf32, #tpu.memory_space<vmem>>, vector<1x4x128xf32>
    %141 = vector.shape_cast %140 : vector<1x4x128xf32> to vector<4x128xf32>
    %cst_70 = arith.constant 1.000000e+00 : f32
    %142 = vector.broadcast %cst_70 : f32 to vector<4x128xf32>
    %143 = arith.subf %142, %139 : vector<4x128xf32>
    %144 = arith.select %3, %139, %143 : vector<4x128xi1>, vector<4x128xf32>
    %145 = math.log %144 : vector<4x128xf32>
    %cst_71 = arith.constant -1.000000e+02 : f32
    %146 = vector.broadcast %cst_71 : f32 to vector<4x128xf32>
    %147 = arith.maximumf %145, %146 : vector<4x128xf32>
    %cst_72 = arith.constant 0.000000e+00 : f32
    %148 = vector.broadcast %cst_72 : f32 to vector<4x128xf32>
    %149 = arith.subf %148, %147 : vector<4x128xf32>
    %cst_73 = arith.constant 1.000000e+00 : f32
    %150 = vector.broadcast %cst_73 : f32 to vector<4x128xf32>
    %151 = arith.subf %150, %144 : vector<4x128xf32>
    %152 = arith.mulf %151, %151 : vector<4x128xf32>
    %153 = arith.mulf %152, %149 : vector<4x128xf32>
    %cst_74 = arith.constant dense<0.000000e+00> : vector<128xf32>
    %154 = vector.multi_reduction <add>, %153, %cst_74 [0] : vector<4x128xf32> to vector<128xf32>
    %155 = vector.shape_cast %154 : vector<128xf32> to vector<1x128xf32>
    %cst_75 = arith.constant 1.000000e+00 : f32
    %156 = vector.broadcast %cst_75 : f32 to vector<4x128xf32>
    %157 = arith.subf %156, %141 : vector<4x128xf32>
    %158 = arith.select %5, %141, %157 : vector<4x128xi1>, vector<4x128xf32>
    %159 = math.log %158 : vector<4x128xf32>
    %cst_76 = arith.constant -1.000000e+02 : f32
    %160 = vector.broadcast %cst_76 : f32 to vector<4x128xf32>
    %161 = arith.maximumf %159, %160 : vector<4x128xf32>
    %cst_77 = arith.constant 0.000000e+00 : f32
    %162 = vector.broadcast %cst_77 : f32 to vector<4x128xf32>
    %163 = arith.subf %162, %161 : vector<4x128xf32>
    %cst_78 = arith.constant 1.000000e+00 : f32
    %164 = vector.broadcast %cst_78 : f32 to vector<4x128xf32>
    %165 = arith.subf %164, %158 : vector<4x128xf32>
    %166 = arith.mulf %165, %165 : vector<4x128xf32>
    %167 = arith.mulf %166, %163 : vector<4x128xf32>
    %cst_79 = arith.constant dense<0.000000e+00> : vector<128xf32>
    %168 = vector.multi_reduction <add>, %167, %cst_79 [0] : vector<4x128xf32> to vector<128xf32>
    %169 = vector.shape_cast %168 : vector<128xf32> to vector<1x128xf32>
    %170 = arith.addf %155, %169 : vector<1x128xf32>
    %c5 = arith.constant 5 : index
    %c0_80 = arith.constant 0 : index
    %c0_81 = arith.constant 0 : index
    %171 = vector.load %arg2[%c5, %c0_80, %c0_81] : memref<8x4x128xf32, #tpu.memory_space<vmem>>, vector<1x4x128xf32>
    %172 = vector.shape_cast %171 : vector<1x4x128xf32> to vector<4x128xf32>
    %c5_82 = arith.constant 5 : index
    %c0_83 = arith.constant 0 : index
    %c0_84 = arith.constant 0 : index
    %173 = vector.load %arg3[%c5_82, %c0_83, %c0_84] : memref<8x4x128xf32, #tpu.memory_space<vmem>>, vector<1x4x128xf32>
    %174 = vector.shape_cast %173 : vector<1x4x128xf32> to vector<4x128xf32>
    %cst_85 = arith.constant 1.000000e+00 : f32
    %175 = vector.broadcast %cst_85 : f32 to vector<4x128xf32>
    %176 = arith.subf %175, %172 : vector<4x128xf32>
    %177 = arith.select %3, %172, %176 : vector<4x128xi1>, vector<4x128xf32>
    %178 = math.log %177 : vector<4x128xf32>
    %cst_86 = arith.constant -1.000000e+02 : f32
    %179 = vector.broadcast %cst_86 : f32 to vector<4x128xf32>
    %180 = arith.maximumf %178, %179 : vector<4x128xf32>
    %cst_87 = arith.constant 0.000000e+00 : f32
    %181 = vector.broadcast %cst_87 : f32 to vector<4x128xf32>
    %182 = arith.subf %181, %180 : vector<4x128xf32>
    %cst_88 = arith.constant 1.000000e+00 : f32
    %183 = vector.broadcast %cst_88 : f32 to vector<4x128xf32>
    %184 = arith.subf %183, %177 : vector<4x128xf32>
    %185 = arith.mulf %184, %184 : vector<4x128xf32>
    %186 = arith.mulf %185, %182 : vector<4x128xf32>
    %cst_89 = arith.constant dense<0.000000e+00> : vector<128xf32>
    %187 = vector.multi_reduction <add>, %186, %cst_89 [0] : vector<4x128xf32> to vector<128xf32>
    %188 = vector.shape_cast %187 : vector<128xf32> to vector<1x128xf32>
    %cst_90 = arith.constant 1.000000e+00 : f32
    %189 = vector.broadcast %cst_90 : f32 to vector<4x128xf32>
    %190 = arith.subf %189, %174 : vector<4x128xf32>
    %191 = arith.select %5, %174, %190 : vector<4x128xi1>, vector<4x128xf32>
    %192 = math.log %191 : vector<4x128xf32>
    %cst_91 = arith.constant -1.000000e+02 : f32
    %193 = vector.broadcast %cst_91 : f32 to vector<4x128xf32>
    %194 = arith.maximumf %192, %193 : vector<4x128xf32>
    %cst_92 = arith.constant 0.000000e+00 : f32
    %195 = vector.broadcast %cst_92 : f32 to vector<4x128xf32>
    %196 = arith.subf %195, %194 : vector<4x128xf32>
    %cst_93 = arith.constant 1.000000e+00 : f32
    %197 = vector.broadcast %cst_93 : f32 to vector<4x128xf32>
    %198 = arith.subf %197, %191 : vector<4x128xf32>
    %199 = arith.mulf %198, %198 : vector<4x128xf32>
    %200 = arith.mulf %199, %196 : vector<4x128xf32>
    %cst_94 = arith.constant dense<0.000000e+00> : vector<128xf32>
    %201 = vector.multi_reduction <add>, %200, %cst_94 [0] : vector<4x128xf32> to vector<128xf32>
    %202 = vector.shape_cast %201 : vector<128xf32> to vector<1x128xf32>
    %203 = arith.addf %188, %202 : vector<1x128xf32>
    %c6 = arith.constant 6 : index
    %c0_95 = arith.constant 0 : index
    %c0_96 = arith.constant 0 : index
    %204 = vector.load %arg2[%c6, %c0_95, %c0_96] : memref<8x4x128xf32, #tpu.memory_space<vmem>>, vector<1x4x128xf32>
    %205 = vector.shape_cast %204 : vector<1x4x128xf32> to vector<4x128xf32>
    %c6_97 = arith.constant 6 : index
    %c0_98 = arith.constant 0 : index
    %c0_99 = arith.constant 0 : index
    %206 = vector.load %arg3[%c6_97, %c0_98, %c0_99] : memref<8x4x128xf32, #tpu.memory_space<vmem>>, vector<1x4x128xf32>
    %207 = vector.shape_cast %206 : vector<1x4x128xf32> to vector<4x128xf32>
    %cst_100 = arith.constant 1.000000e+00 : f32
    %208 = vector.broadcast %cst_100 : f32 to vector<4x128xf32>
    %209 = arith.subf %208, %205 : vector<4x128xf32>
    %210 = arith.select %3, %205, %209 : vector<4x128xi1>, vector<4x128xf32>
    %211 = math.log %210 : vector<4x128xf32>
    %cst_101 = arith.constant -1.000000e+02 : f32
    %212 = vector.broadcast %cst_101 : f32 to vector<4x128xf32>
    %213 = arith.maximumf %211, %212 : vector<4x128xf32>
    %cst_102 = arith.constant 0.000000e+00 : f32
    %214 = vector.broadcast %cst_102 : f32 to vector<4x128xf32>
    %215 = arith.subf %214, %213 : vector<4x128xf32>
    %cst_103 = arith.constant 1.000000e+00 : f32
    %216 = vector.broadcast %cst_103 : f32 to vector<4x128xf32>
    %217 = arith.subf %216, %210 : vector<4x128xf32>
    %218 = arith.mulf %217, %217 : vector<4x128xf32>
    %219 = arith.mulf %218, %215 : vector<4x128xf32>
    %cst_104 = arith.constant dense<0.000000e+00> : vector<128xf32>
    %220 = vector.multi_reduction <add>, %219, %cst_104 [0] : vector<4x128xf32> to vector<128xf32>
    %221 = vector.shape_cast %220 : vector<128xf32> to vector<1x128xf32>
    %cst_105 = arith.constant 1.000000e+00 : f32
    %222 = vector.broadcast %cst_105 : f32 to vector<4x128xf32>
    %223 = arith.subf %222, %207 : vector<4x128xf32>
    %224 = arith.select %5, %207, %223 : vector<4x128xi1>, vector<4x128xf32>
    %225 = math.log %224 : vector<4x128xf32>
    %cst_106 = arith.constant -1.000000e+02 : f32
    %226 = vector.broadcast %cst_106 : f32 to vector<4x128xf32>
    %227 = arith.maximumf %225, %226 : vector<4x128xf32>
    %cst_107 = arith.constant 0.000000e+00 : f32
    %228 = vector.broadcast %cst_107 : f32 to vector<4x128xf32>
    %229 = arith.subf %228, %227 : vector<4x128xf32>
    %cst_108 = arith.constant 1.000000e+00 : f32
    %230 = vector.broadcast %cst_108 : f32 to vector<4x128xf32>
    %231 = arith.subf %230, %224 : vector<4x128xf32>
    %232 = arith.mulf %231, %231 : vector<4x128xf32>
    %233 = arith.mulf %232, %229 : vector<4x128xf32>
    %cst_109 = arith.constant dense<0.000000e+00> : vector<128xf32>
    %234 = vector.multi_reduction <add>, %233, %cst_109 [0] : vector<4x128xf32> to vector<128xf32>
    %235 = vector.shape_cast %234 : vector<128xf32> to vector<1x128xf32>
    %236 = arith.addf %221, %235 : vector<1x128xf32>
    %c7 = arith.constant 7 : index
    %c0_110 = arith.constant 0 : index
    %c0_111 = arith.constant 0 : index
    %237 = vector.load %arg2[%c7, %c0_110, %c0_111] : memref<8x4x128xf32, #tpu.memory_space<vmem>>, vector<1x4x128xf32>
    %238 = vector.shape_cast %237 : vector<1x4x128xf32> to vector<4x128xf32>
    %c7_112 = arith.constant 7 : index
    %c0_113 = arith.constant 0 : index
    %c0_114 = arith.constant 0 : index
    %239 = vector.load %arg3[%c7_112, %c0_113, %c0_114] : memref<8x4x128xf32, #tpu.memory_space<vmem>>, vector<1x4x128xf32>
    %240 = vector.shape_cast %239 : vector<1x4x128xf32> to vector<4x128xf32>
    %cst_115 = arith.constant 1.000000e+00 : f32
    %241 = vector.broadcast %cst_115 : f32 to vector<4x128xf32>
    %242 = arith.subf %241, %238 : vector<4x128xf32>
    %243 = arith.select %3, %238, %242 : vector<4x128xi1>, vector<4x128xf32>
    %244 = math.log %243 : vector<4x128xf32>
    %cst_116 = arith.constant -1.000000e+02 : f32
    %245 = vector.broadcast %cst_116 : f32 to vector<4x128xf32>
    %246 = arith.maximumf %244, %245 : vector<4x128xf32>
    %cst_117 = arith.constant 0.000000e+00 : f32
    %247 = vector.broadcast %cst_117 : f32 to vector<4x128xf32>
    %248 = arith.subf %247, %246 : vector<4x128xf32>
    %cst_118 = arith.constant 1.000000e+00 : f32
    %249 = vector.broadcast %cst_118 : f32 to vector<4x128xf32>
    %250 = arith.subf %249, %243 : vector<4x128xf32>
    %251 = arith.mulf %250, %250 : vector<4x128xf32>
    %252 = arith.mulf %251, %248 : vector<4x128xf32>
    %cst_119 = arith.constant dense<0.000000e+00> : vector<128xf32>
    %253 = vector.multi_reduction <add>, %252, %cst_119 [0] : vector<4x128xf32> to vector<128xf32>
    %254 = vector.shape_cast %253 : vector<128xf32> to vector<1x128xf32>
    %cst_120 = arith.constant 1.000000e+00 : f32
    %255 = vector.broadcast %cst_120 : f32 to vector<4x128xf32>
    %256 = arith.subf %255, %240 : vector<4x128xf32>
    %257 = arith.select %5, %240, %256 : vector<4x128xi1>, vector<4x128xf32>
    %258 = math.log %257 : vector<4x128xf32>
    %cst_121 = arith.constant -1.000000e+02 : f32
    %259 = vector.broadcast %cst_121 : f32 to vector<4x128xf32>
    %260 = arith.maximumf %258, %259 : vector<4x128xf32>
    %cst_122 = arith.constant 0.000000e+00 : f32
    %261 = vector.broadcast %cst_122 : f32 to vector<4x128xf32>
    %262 = arith.subf %261, %260 : vector<4x128xf32>
    %cst_123 = arith.constant 1.000000e+00 : f32
    %263 = vector.broadcast %cst_123 : f32 to vector<4x128xf32>
    %264 = arith.subf %263, %257 : vector<4x128xf32>
    %265 = arith.mulf %264, %264 : vector<4x128xf32>
    %266 = arith.mulf %265, %262 : vector<4x128xf32>
    %cst_124 = arith.constant dense<0.000000e+00> : vector<128xf32>
    %267 = vector.multi_reduction <add>, %266, %cst_124 [0] : vector<4x128xf32> to vector<128xf32>
    %268 = vector.shape_cast %267 : vector<128xf32> to vector<1x128xf32>
    %269 = arith.addf %254, %268 : vector<1x128xf32>
    %270 = tpu.concatenate %38, %71, %104, %137, %170, %203, %236, %269 in 0 : vector<1x128xf32>, vector<1x128xf32>, vector<1x128xf32>, vector<1x128xf32>, vector<1x128xf32>, vector<1x128xf32>, vector<1x128xf32>, vector<1x128xf32> -> vector<8x128xf32>
    %c0_125 = arith.constant 0 : index
    %c0_126 = arith.constant 0 : index
    %c0_127 = arith.constant 0 : index
    %c0_128 = arith.constant 0 : index
    %271 = vector.load %arg6[%c0_125, %c0_126, %c0_127, %c0_128] : memref<1x1x8x128xf32, #tpu.memory_space<vmem>>, vector<1x1x8x128xf32>
    %272 = vector.shape_cast %271 : vector<1x1x8x128xf32> to vector<8x128xf32>
    %273 = vector.shape_cast %270 : vector<8x128xf32> to vector<1x1x8x128xf32>
    tpu.vector_store %arg6[%c0_125, %c0_126, %c0_127, %c0_128], %273 {strides = array<i32>} : memref<1x1x8x128xf32, #tpu.memory_space<vmem>>, vector<1x1x8x128xf32>,
    return
  }
  func.func @transform_0(%arg0: i32, %arg1: i32) -> (i32, i32, i32) {
    %c0_i32 = arith.constant 0 : i32
    %c0_i32_0 = arith.constant 0 : i32
    return %arg1, %arg0, %c0_i32 : i32, i32, i32
  }
  func.func @transform_1(%arg0: i32, %arg1: i32) -> (i32, i32, i32) {
    %c0_i32 = arith.constant 0 : i32
    %c0_i32_0 = arith.constant 0 : i32
    return %arg1, %arg0, %c0_i32 : i32, i32, i32
  }
  func.func @transform_2(%arg0: i32, %arg1: i32) -> (i32, i32) {
    %c0_i32 = arith.constant 0 : i32
    %c0_i32_0 = arith.constant 0 : i32
    return %arg0, %c0_i32 : i32, i32
  }
  func.func @transform_3(%arg0: i32, %arg1: i32) -> (i32, i32) {
    %c0_i32 = arith.constant 0 : i32
    %c0_i32_0 = arith.constant 0 : i32
    return %arg0, %c0_i32 : i32, i32
  }
  func.func @transform_4(%arg0: i32, %arg1: i32) -> (i32, i32, i32, i32) {
    %c0_i32 = arith.constant 0 : i32
    %c0_i32_0 = arith.constant 0 : i32
    %c0_i32_1 = arith.constant 0 : i32
    return %arg0, %arg1, %c0_i32, %c0_i32_0 : i32, i32, i32, i32
  }
}

</mosaic_0001>

<bundles_post_ra>
// kernel: tpu_custom_call.1
= control target key start
LH: loop header
LB: loop body
LE: loop exit
PB: predicated region body
PF: predicated region fallthrough
CT: control target
= control target key end

     0   :  { %9 = vsyncpa [#allocation3], 0  ;;  %s645_s0 = inlined_call_operand.hbm [shape: f32[8,4,128], index: 0, kind: input, shape index: {}]   ;;  %s646_s1 = inlined_call_operand.hbm [shape: f32[8,4,128], index: 1, kind: input, shape index: {}]   ;;  %s647_s2 = inlined_call_operand.vmem [shape: f32[4,128], index: 2, kind: input, shape index: {}]   ;;  %s648_s3 = inlined_call_operand.vmem [shape: f32[4,128], index: 3, kind: input, shape index: {}]   ;;  %s649_s4 = inlined_call_operand.hbm [shape: f32[1,1,8,128], index: 4, kind: output, shape index: {}]  }
   0x1   :  { %10 = vsyncpa [#allocation6], 0 }
   0x2   :  { %11 = vsyncpa [#allocation4], 0  ;;  %s484_s15 = smov [#allocation2]   ;;  %s412_s19 = scalar_lea.hbm %s645_s0, 512 }
   0x3   :  { %s17_s16 = sshll.u32 %s484_s15, 4  ;;  %p413_p0 = scmp.ne.s32.totalorder %s645_s0, %s412_s19  ;;  %s18_s16 = int_to_ptr.vmem [resolvable:$true] %s17_s16 }
   0x4   :  { %p416_p1 = scmp.lt.u32.totalorder %s412_s19, %s645_s0 }
   0x6   :  { %p418_p2 = pnand %p416_p1, %p413_p0 }
   0x8   :  { %421 = shalt.err (!%p418_p2)
}
   0x9   :  { %s422_s24 = scalar_lea.vmem %s18_s16, 512  ;;  %p427_p4 = scmp.lt.s32.totalorder %s18_s16, %s18_s16 }
   0xa   :  { %p423_p3 = scmp.ne.s32.totalorder %s18_s16, %s422_s24  ;;  %p428_p5 = scmp.lt.s32.totalorder %s422_s24, %s422_s24 }
   0xc   :  { %p429_p6 = por %p428_p5, %p427_p4 }
   0xe   :  { %p430_p7 = pnand %p429_p6, %p423_p3 }
  0x10   :  { %433 = shalt.err (!%p430_p7)
}
  0x11   :  { %s485_s25 = smov 64   ;;  %s486_s26 = smov 4  }
  0x12   :  { %23 = dma.hbm_to_vmem [thread:$0]  %s645_s0, 512, %s18_s16, [#allocation3], %s485_s25, %s485_s25, %s486_s26  }
  0x13   :  { %s487_s29 = smov [#allocation5]   ;;  %s434_s7 = scalar_lea.hbm %s646_s1, 512 }
  0x14   :  { %s29_s30 = sshll.u32 %s487_s29, 4  ;;  %p435_p8 = scmp.ne.s32.totalorder %s646_s1, %s434_s7  ;;  %s30_s30 = int_to_ptr.vmem [resolvable:$true] %s29_s30 }
  0x15   :  { %p438_p9 = scmp.lt.u32.totalorder %s434_s7, %s646_s1 }
  0x17   :  { %p440_p10 = pnand %p438_p9, %p435_p8 }
  0x19   :  { %443 = shalt.err (!%p440_p10)
}
  0x1a   :  { %s444_s12 = scalar_lea.vmem %s30_s30, 512  ;;  %p449_p12 = scmp.lt.s32.totalorder %s30_s30, %s30_s30 }
  0x1b   :  { %p445_p11 = scmp.ne.s32.totalorder %s30_s30, %s444_s12  ;;  %p450_p13 = scmp.lt.s32.totalorder %s444_s12, %s444_s12 }
  0x1d   :  { %p451_p0 = por %p450_p13, %p449_p12 }
  0x1f   :  { %p452_p1 = pnand %p451_p0, %p445_p11 }
  0x21   :  { %455 = shalt.err (!%p452_p1)
}
  0x22   :  { %35 = dma.hbm_to_vmem [thread:$0]  %s646_s1, 512, %s30_s30, [#allocation6], %s485_s25, %s485_s25, %s486_s26  }
  0x23   :  { %478 = dma.done.wait [#allocation3], 512  }
  0x24   :  { %479 = vsyncadd [#allocation3], 4294966784 }
  0x25   :  { %480 = dma.done.wait [#allocation6], 512  }
  0x26   :  { %481 = vsyncadd [#allocation6], 4294966784  ;;  %v541_v0 = vld [vmem:[%s647_s2] sm:$0xf]  ;;  %v87_v6 = vld [vmem:[#allocation2 + $0x4] sm:$0xf] }
  0x27   :  { %v546_v1 = vld [vmem:[%s648_s3] sm:$0xf]  ;;  %vm48_vm0 = vcmp.eq.f32.partialorder %v541_v0, 1.0  ;;  %v89_v7 = vld [vmem:[#allocation5 + $0x4] sm:$0xf]  ;;  %v90_v9 = vsub.f32 1.0, %v87_v6 }
  0x28   :  { %v50_v2 = vld [vmem:[#allocation2] sm:$0xf]  ;;  %vm49_vm1 = vcmp.eq.f32.partialorder %v546_v1, 1.0  ;;  %v106_v10 = vsub.f32 1.0, %v89_v7  ;;  %v124_v11 = vld [vmem:[#allocation2 + $0x8] sm:$0xf] }
  0x29   :  { %v51_v3 = vld [vmem:[#allocation5] sm:$0xf]  ;;  %v52_v4 = vsub.f32 1.0, %v50_v2  ;;  %v126_v13 = vld [vmem:[#allocation5 + $0x8] sm:$0xf]  ;;  %v127_v14 = vsub.f32 1.0, %v124_v11  ;;  %v91_v15 = vsel %vm48_vm0, %v87_v6, %v90_v9 }
  0x2a   :  { %v69_v5 = vsub.f32 1.0, %v51_v3  ;;  %v107_v16 = vsel %vm49_vm1, %v89_v7, %v106_v10  ;;  %v143_v18 = vsub.f32 1.0, %v126_v13  ;;  %v161_v19 = vld [vmem:[#allocation2 + $0xc] sm:$0xf]  ;;  %v198_v24 = vld [vmem:[#allocation2 + $0x10] sm:$0xf] }
  0x2b   :  { %v53_v8 = vsel %vm48_vm0, %v50_v2, %v52_v4  ;;  %v560_v17 = vsel %vm48_vm0, %v124_v11, %v127_v14  ;;  %v163_v20 = vld [vmem:[#allocation5 + $0xc] sm:$0xf]  ;;  %v164_v22 = vsub.f32 1.0, %v161_v19  ;;  %v200_v27 = vld [vmem:[#allocation5 + $0x10] sm:$0xf]  ;;  %v201_v32 = vsub.f32 1.0, %v198_v24 }
  0x2c   :  { %380 = vlog2.f32 %v53_v8  ;;  %v70_v12 = vsel %vm49_vm1, %v51_v3, %v69_v5  ;;  %v564_v21 = vsel %vm49_vm1, %v126_v13, %v143_v18  ;;  %v180_v23 = vsub.f32 1.0, %v163_v20  ;;  %v235_v30 = vld [vmem:[#allocation2 + $0x14] sm:$0xf]  ;;  %v272_v40 = vld [vmem:[#allocation2 + $0x18] sm:$0xf]  ;;  %s488_s1 = smov [#allocation7]  }
  0x2d   :  { %382 = vlog2.f32 %v70_v12  ;;  %v570_v26 = vsel %vm48_vm0, %v161_v19, %v164_v22  ;;  %v237_v33 = vld [vmem:[#allocation5 + $0x14] sm:$0xf]  ;;  %v217_v37 = vsub.f32 1.0, %v200_v27  ;;  %v58_v38 = vsub.f32 1.0, %v53_v8  ;;  %s365_s2 = sshll.u32 %s488_s1, 4  ;;  %s366_s2 = int_to_ptr.vmem [resolvable:$true] %s365_s2 }
  0x2e   :  { %384 = vlog2.f32 %v91_v15  ;;  %v574_v29 = vsel %vm49_vm1, %v163_v20, %v180_v23  ;;  %v238_v39 = vsub.f32 1.0, %v235_v30  ;;  %v75_v44 = vsub.f32 1.0, %v70_v12  ;;  %s456_s3 = scalar_lea.vmem %s366_s2, 128  ;;  %p461_p3 = scmp.lt.s32.totalorder %s366_s2, %s366_s2 }
  0x2f   :  { %386 = vlog2.f32 %v107_v16  ;;  %v202_v45 = vsel %vm48_vm0, %v198_v24, %v201_v32  ;;  %v254_v46 = vsub.f32 1.0, %v237_v33  ;;  %v582_v49 = vsel %vm49_vm1, %v200_v27, %v217_v37  ;;  %p457_p2 = scmp.ne.s32.totalorder %s366_s2, %s456_s3  ;;  %p462_p4 = scmp.lt.s32.totalorder %s456_s3, %s456_s3 }
  0x30   :  { %388 = vlog2.f32 %v560_v17  ;;  %v275_v50 = vsub.f32 1.0, %v272_v40  ;;  %v59_v52 = vmul.f32 %v58_v38, %v58_v38  ;;  %v96_v53 = vsub.f32 1.0, %v91_v15 }
  0x31   :  { %390 = vlog2.f32 %v564_v21  ;;  %v112_v54 = vsub.f32 1.0, %v107_v16  ;;  %v239_v55 = vsel %vm48_vm0, %v235_v30, %v238_v39  ;;  %v76_v59 = vmul.f32 %v75_v44, %v75_v44  ;;  %p463_p5 = por %p462_p4, %p461_p3 }
  0x32   :  { %392 = vlog2.f32 %v570_v26  ;;  %v133_v60 = vsub.f32 1.0, %v560_v17  ;;  %v590_v61 = vsel %vm49_vm1, %v237_v33, %v254_v46  ;;  %v594_v3 = vsel %vm48_vm0, %v272_v40, %v275_v50 }
  0x33   :  { %394 = vlog2.f32 %v574_v29  ;;  %v97_v4 = vmul.f32 %v96_v53, %v96_v53  ;;  %v113_v5 = vmul.f32 %v112_v54, %v112_v54  ;;  %vm61_vm2 = vcmask 1043456   ;;  %p464_p6 = pnand %p463_p5, %p457_p2 }
  0x34   :  { %396 = vlog2.f32 %v202_v45  ;;  %v149_v11 = vsub.f32 1.0, %v564_v21  ;;  %v134_v14 = vmul.f32 %v133_v60, %v133_v60  ;;  %v170_v17 = vsub.f32 1.0, %v570_v26 }
  0x35   :  { %398 = vlog2.f32 %v582_v49  ;;  %v186_v18 = vsub.f32 1.0, %v574_v29  ;;  %v207_v19 = vsub.f32 1.0, %v202_v45  ;;  %v223_v27 = vsub.f32 1.0, %v582_v49 }
  0x36   :  { %v381_v25 = vpop.eup %380  ;;  %400 = vlog2.f32 %v239_v55  ;;  %v244_v32 = vsub.f32 1.0, %v239_v55  ;;  %v171_v26 = vmul.f32 %v170_v17, %v170_v17  ;;  %v260_v49 = vsub.f32 1.0, %v590_v61 }
  0x37   :  { %v383_v28 = vpop.eup %382  ;;  %v55_v35 = vmul.f32 0.6931472, %v381_v25  ;;  %402 = vlog2.f32 %v590_v61  ;;  %v150_v25 = vmul.f32 %v149_v11, %v149_v11  ;;  %v208_v29 = vmul.f32 %v207_v19, %v207_v19 }
  0x38   :  { %v385_v31 = vpop.eup %384  ;;  %v72_v36 = vmul.f32 0.6931472, %v383_v28  ;;  %404 = vlog2.f32 %v594_v3  ;;  %v224_v45 = vmul.f32 %v223_v27, %v223_v27  ;;  %vm345_vm3 = vcmask 1040384  }
  0x39   :  { %v387_v34 = vpop.eup %386  ;;  %v93_v41 = vmul.f32 0.6931472, %v385_v31  ;;  %v56_v47 = vmax.f32 %v55_v35, -100.0  ;;  %v187_v35 = vmul.f32 %v186_v18, %v186_v18  ;;  %v281_v18 = vsub.f32 1.0, %v594_v3 }
  0x3a   :  { %v109_v42 = vmul.f32 0.6931472, %v387_v34  ;;  %v389_v43 = vpop.eup %388  ;;  %v73_v48 = vmax.f32 %v72_v36, -100.0  ;;  %v274_v36 = vld [vmem:[#allocation5 + $0x18] sm:$0xf]  ;;  %vm347_vm4 = vcmask 1041408  }
  0x3b   :  { %v391_v51 = vpop.eup %390  ;;  %v94_v56 = vmax.f32 %v93_v41, -100.0  ;;  %v130_v58 = vmul.f32 0.6931472, %v389_v43  ;;  %v57_v62 = vsub.f32 0.0, %v56_v47  ;;  %v291_v50 = vsub.f32 1.0, %v274_v36 }
  0x3c   :  { %v110_v57 = vmax.f32 %v109_v42, -100.0  ;;  %v74_v63 = vsub.f32 0.0, %v73_v48  ;;  %v146_v2 = vmul.f32 0.6931472, %v391_v51  ;;  %v393_v6 = vpop.eup %392  ;;  %v245_v48 = vmul.f32 %v244_v32, %v244_v32 }
  0x3d   :  { %v95_v7 = vsub.f32 0.0, %v94_v56  ;;  %v131_v9 = vmax.f32 %v130_v58, -100.0  ;;  %v395_v10 = vpop.eup %394  ;;  %v60_v12 = vmul.f32 %v59_v52, %v57_v62  ;;  %v167_v16 = vmul.f32 0.6931472, %v393_v6 }
  0x3e   :  { %v111_v8 = vsub.f32 0.0, %v110_v57  ;;  %v77_v13 = vmul.f32 %v76_v59, %v74_v63  ;;  %v147_v15 = vmax.f32 %v146_v2, -100.0  ;;  %v183_v24 = vmul.f32 0.6931472, %v395_v10  ;;  %v397_v21 = vpop.eup %396 }
  0x3f   :  { %v98_v20 = vmul.f32 %v97_v4, %v95_v7  ;;  %v132_v23 = vsub.f32 0.0, %v131_v9  ;;  %v62_v28 = vsel %vm61_vm2, %v60_v12, 0.0  ;;  %v399_v33 = vpop.eup %398  ;;  %v168_v34 = vmax.f32 %v167_v16, -100.0 }
  0x40   :  { %v114_v22 = vmul.f32 %v113_v5, %v111_v8  ;;  %v78_v30 = vsel %vm61_vm2, %v77_v13, 0.0  ;;  %v148_v31 = vsub.f32 0.0, %v147_v15  ;;  %v184_v40 = vmax.f32 %v183_v24, -100.0  ;;  %v401_v41 = vpop.eup %400 }
  0x41   :  { %v99_v37 = vsel %vm61_vm2, %v98_v20, 0.0  ;;  %v135_v39 = vmul.f32 %v134_v14, %v132_v23  ;;  %v63_v42 = vrot.slane %v62_v28, 4  ;;  %v79_v43 = vrot.slane %v78_v30, 4  ;;  %v403_v46 = vpop.eup %402 }
  0x42   :  { %v115_v38 = vsel %vm61_vm2, %v114_v22, 0.0  ;;  %v204_v44 = vmul.f32 0.6931472, %v397_v21  ;;  %v151_v47 = vmul.f32 %v150_v25, %v148_v31  ;;  %v405_v51 = vpop.eup %404  ;;  %v100_v52 = vrot.slane %v99_v37, 4 }
  0x43   :  { %v116_v53 = vrot.slane %v115_v38, 4  ;;  %v169_v54 = vsub.f32 0.0, %v168_v34  ;;  %v136_v56 = vsel %vm61_vm2, %v135_v39, 0.0  ;;  %v185_v57 = vsub.f32 0.0, %v184_v40 }
  0x44   :  { %v205_v55 = vmax.f32 %v204_v44, -100.0  ;;  %v220_v58 = vmul.f32 0.6931472, %v399_v33  ;;  %v241_v59 = vmul.f32 0.6931472, %v401_v41  ;;  %v64_v60 = vadd.f32 %v63_v42, %v62_v28 }
  0x45   :  { %v80_v62 = vadd.f32 %v79_v43, %v78_v30  ;;  %v257_v2 = vmul.f32 0.6931472, %v403_v46  ;;  %v152_v4 = vsel %vm61_vm2, %v151_v47, 0.0  ;;  %v278_v61 = vmul.f32 0.6931472, %v405_v51 }
  0x46   :  { %v206_v63 = vsub.f32 0.0, %v205_v55  ;;  %v221_v5 = vmax.f32 %v220_v58, -100.0  ;;  %v242_v6 = vmax.f32 %v241_v59, -100.0  ;;  %v101_v7 = vadd.f32 %v100_v52, %v99_v37  ;;  %v311_v43 = vld [vmem:[#allocation5 + $0x1c] sm:$0xf] }
  0x47   :  { %v137_v8 = vrot.slane %v136_v56, 4  ;;  %v172_v9 = vmul.f32 %v171_v26, %v169_v54  ;;  %v258_v10 = vmax.f32 %v257_v2, -100.0  ;;  %v117_v11 = vadd.f32 %v116_v53, %v115_v38 }
  0x48   :  { %v188_v12 = vmul.f32 %v187_v35, %v185_v57  ;;  %v209_v13 = vmul.f32 %v208_v29, %v206_v63  ;;  %v222_v14 = vsub.f32 0.0, %v221_v5  ;;  %v153_v15 = vrot.slane %v152_v4, 4  ;;  %v309_v35 = vld [vmem:[#allocation2 + $0x1c] sm:$0xf] }
  0x49   :  { %v243_v16 = vsub.f32 0.0, %v242_v6  ;;  %v279_v17 = vmax.f32 %v278_v61, -100.0  ;;  %v65_v19 = vrot.slane %v64_v60, 2  ;;  %v259_v22 = vsub.f32 0.0, %v258_v10 }
  0x4a   :  { %v225_v20 = vmul.f32 %v224_v45, %v222_v14  ;;  %v261_v23 = vmul.f32 %v260_v49, %v260_v49  ;;  %v81_v24 = vrot.slane %v80_v62, 2  ;;  %v102_v25 = vrot.slane %v101_v7, 2 }
  0x4b   :  { %v138_v27 = vadd.f32 %v137_v8, %v136_v56  ;;  %v173_v21 = vsel %vm61_vm2, %v172_v9, 0.0  ;;  %v118_v28 = vrot.slane %v117_v11, 2  ;;  %v189_v30 = vsel %vm61_vm2, %v188_v12, 0.0 }
  0x4c   :  { %v210_v31 = vsel %vm61_vm2, %v209_v13, 0.0  ;;  %v615_v32 = vsel %vm49_vm1, %v274_v36, %v291_v50  ;;  %v154_v33 = vadd.f32 %v153_v15, %v152_v4  ;;  %v246_v3 = vmul.f32 %v245_v48, %v243_v16 }
  0x4d   :  { %v280_v34 = vsub.f32 0.0, %v279_v17  ;;  %v282_v26 = vmul.f32 %v281_v18, %v281_v18  ;;  %v174_v29 = vrot.slane %v173_v21, 4  ;;  %v226_v37 = vsel %vm61_vm2, %v225_v20, 0.0 }
  0x4e   :  { %v262_v38 = vmul.f32 %v261_v23, %v259_v22  ;;  %406 = vlog2.f32 %v615_v32  ;;  %v66_v39 = vadd.f32 %v65_v19, %v64_v60  ;;  %v82_v40 = vadd.f32 %v81_v24, %v80_v62 }
  0x4f   :  { %v190_v41 = vrot.slane %v189_v30, 4  ;;  %v211_v42 = vrot.slane %v210_v31, 4  ;;  %v103_v44 = vadd.f32 %v102_v25, %v101_v7  ;;  %v119_v45 = vadd.f32 %v118_v28, %v117_v11 }
  0x50   :  { %v139_v36 = vrot.slane %v138_v27, 2  ;;  %v312_v46 = vsub.f32 1.0, %v309_v35  ;;  %v155_v47 = vrot.slane %v154_v33, 2  ;;  %v227_v48 = vrot.slane %v226_v37, 4 }
  0x51   :  { %v247_v49 = vsel %vm61_vm2, %v246_v3, 0.0  ;;  %v283_v50 = vmul.f32 %v282_v26, %v280_v34  ;;  %v175_v51 = vadd.f32 %v174_v29, %v173_v21  ;;  %v263_v52 = vsel %vm61_vm2, %v262_v38, 0.0 }
  0x52   :  { %v313_v53 = vsel %vm48_vm0, %v309_v35, %v312_v46  ;;  %v328_v54 = vsub.f32 1.0, %v311_v43  ;;  %v67_v55 = vrot.slane %v66_v39, 1  ;;  %v191_v56 = vadd.f32 %v190_v41, %v189_v30 }
  0x53   :  { %v212_v57 = vadd.f32 %v211_v42, %v210_v31  ;;  %408 = vlog2.f32 %v313_v53  ;;  %v83_v58 = vrot.slane %v82_v40, 1  ;;  %v140_v59 = vadd.f32 %v139_v36, %v138_v27 }
  0x54   :  { %v248_v60 = vrot.slane %v247_v49, 4  ;;  %v329_v62 = vsel %vm49_vm1, %v311_v43, %v328_v54  ;;  %v228_v63 = vadd.f32 %v227_v48, %v226_v37  ;;  %v264_v2 = vrot.slane %v263_v52, 4 }
  0x55   :  { %v284_v4 = vsel %vm61_vm2, %v283_v50, 0.0  ;;  %410 = vlog2.f32 %v329_v62  ;;  %v104_v5 = vrot.slane %v103_v44, 1  ;;  %v120_v6 = vrot.slane %v119_v45, 1 }
  0x56   :  { %v156_v0 = vadd.f32 %v155_v47, %v154_v33  ;;  %v176_v61 = vrot.slane %v175_v51, 2  ;;  %v192_v7 = vrot.slane %v191_v56, 2  ;;  %v213_v8 = vrot.slane %v212_v57, 2 }
  0x57   :  { %v297_v9 = vsub.f32 1.0, %v615_v32  ;;  %v68_v11 = vadd.f32 %v67_v55, %v66_v39  ;;  %v84_v12 = vadd.f32 %v83_v58, %v82_v40  ;;  %v141_v13 = vrot.slane %v140_v59, 1 }
  0x58   :  { %v407_v10 = vpop.eup %406  ;;  %v285_v14 = vrot.slane %v284_v4, 4  ;;  %v229_v1 = vrot.slane %v228_v63, 2  ;;  %v249_v15 = vadd.f32 %v248_v60, %v247_v49  ;;  %v265_v16 = vadd.f32 %v264_v2, %v263_v52 }
  0x59   :  { %v294_v17 = vmul.f32 0.6931472, %v407_v10  ;;  %v105_v18 = vadd.f32 %v104_v5, %v103_v44  ;;  %v121_v19 = vadd.f32 %v120_v6, %v119_v45  ;;  %v157_v20 = vrot.slane %v156_v0, 1 }
  0x5a   :  { %v177_v22 = vadd.f32 %v176_v61, %v175_v51  ;;  %v193_v23 = vadd.f32 %v192_v7, %v191_v56  ;;  %v214_v24 = vadd.f32 %v213_v8, %v212_v57  ;;  %v298_v27 = vmul.f32 %v297_v9, %v297_v9 }
  0x5b   :  { %v295_v25 = vmax.f32 %v294_v17, -100.0  ;;  %v85_v21 = vadd.f32 %v84_v12, %v68_v11  ;;  %v142_v28 = vadd.f32 %v141_v13, %v140_v59  ;;  %v286_v30 = vadd.f32 %v285_v14, %v284_v4 }
  0x5c   :  { %v318_v31 = vsub.f32 1.0, %v313_v53  ;;  %v230_v33 = vadd.f32 %v229_v1, %v228_v63  ;;  %v250_v3 = vrot.slane %v249_v15, 2  ;;  %v266_v34 = vrot.slane %v265_v16, 2 }
  0x5d   :  { %v409_v32 = vpop.eup %408  ;;  %v296_v26 = vsub.f32 0.0, %v295_v25  ;;  %v122_v35 = vadd.f32 %v121_v19, %v105_v18  ;;  %v158_v29 = vadd.f32 %v157_v20, %v156_v0  ;;  %v334_v38 = vsub.f32 1.0, %v329_v62 }
  0x5e   :  { %v315_v37 = vmul.f32 0.6931472, %v409_v32  ;;  %v178_v40 = vrot.slane %v177_v22, 1  ;;  %v194_v41 = vrot.slane %v193_v23, 1  ;;  %v215_v42 = vrot.slane %v214_v24, 1 }
  0x5f   :  { %v411_v39 = vpop.eup %410  ;;  %v299_v43 = vmul.f32 %v298_v27, %v296_v26  ;;  %v287_v44 = vrot.slane %v286_v30, 2  ;;  %v319_v36 = vmul.f32 %v318_v31, %v318_v31  ;;  %v231_v47 = vrot.slane %v230_v33, 1 }
  0x60   :  { %v316_v45 = vmax.f32 %v315_v37, -100.0  ;;  %v331_v46 = vmul.f32 0.6931472, %v411_v39  ;;  %v251_v48 = vadd.f32 %v250_v3, %v249_v15  ;;  %v267_v49 = vadd.f32 %v266_v34, %v265_v16 }
  0x61   :  { %v300_v50 = vsel %vm61_vm2, %v299_v43, 0.0  ;;  %v335_v54 = vmul.f32 %v334_v38, %v334_v38  ;;  %v159_v55 = vadd.f32 %v158_v29, %v142_v28  ;;  %v179_v56 = vadd.f32 %v178_v40, %v177_v22 }
  0x62   :  { %v301_v51 = vrot.slane %v300_v50, 4  ;;  %v317_v52 = vsub.f32 0.0, %v316_v45  ;;  %v332_v53 = vmax.f32 %v331_v46, -100.0  ;;  %v195_v57 = vadd.f32 %v194_v41, %v193_v23 }
  0x63   :  { %v288_v58 = vadd.f32 %v287_v44, %v286_v30  ;;  %v216_v63 = vadd.f32 %v215_v42, %v214_v24  ;;  %v252_v2 = vrot.slane %v251_v48, 1  ;;  %v268_v4 = vrot.slane %v267_v49, 1 }
  0x64   :  { %v302_v59 = vadd.f32 %v301_v51, %v300_v50  ;;  %v320_v60 = vmul.f32 %v319_v36, %v317_v52  ;;  %v333_v62 = vsub.f32 0.0, %v332_v53  ;;  %v346_v5 = vsel %vm345_vm3, %v85_v21, %v122_v35 }
  0x65   :  { %v232_v6 = vadd.f32 %v231_v47, %v230_v33  ;;  %v196_v8 = vadd.f32 %v195_v57, %v179_v56  ;;  %vm349_vm5 = vcmask 1042432   ;;  %v289_v10 = vrot.slane %v288_v58, 1 }
  0x66   :  { %v303_v0 = vrot.slane %v302_v59, 2  ;;  %v321_v61 = vsel %vm61_vm2, %v320_v60, 0.0  ;;  %v336_v7 = vmul.f32 %v335_v54, %v333_v62  ;;  %v348_v13 = vsel %vm347_vm4, %v346_v5, %v159_v55 }
  0x67   :  { %v322_v9 = vrot.slane %v321_v61, 4  ;;  %v253_v14 = vadd.f32 %v252_v2, %v251_v48  ;;  %v269_v1 = vadd.f32 %v268_v4, %v267_v49  ;;  %v233_v17 = vadd.f32 %v232_v6, %v216_v63 }
  0x68   :  { %v304_v11 = vadd.f32 %v303_v0, %v302_v59  ;;  %v337_v12 = vsel %vm61_vm2, %v336_v7, 0.0  ;;  %v350_v22 = vsel %vm349_vm5, %v348_v13, %v196_v8  ;;  %v290_v23 = vadd.f32 %v289_v10, %v288_v58 }
  0x69   :  { %v323_v15 = vadd.f32 %v322_v9, %v321_v61  ;;  %v338_v16 = vrot.slane %v337_v12, 4  ;;  %v270_v25 = vadd.f32 %v269_v1, %v253_v14  ;;  %v351_v28 = vsel %vm61_vm2, %v350_v22, %v233_v17 }
  0x6a   :  { %v305_v18 = vrot.slane %v304_v11, 1  ;;  %vm352_vm6 = vcmask 1044480   ;;  %vm354_vm7 = vcmask 1045504   ;;  %vm356_vm8 = vcmask 1046528  }
  0x6b   :  { %v324_v19 = vrot.slane %v323_v15, 2  ;;  %v339_v20 = vadd.f32 %v338_v16, %v337_v12  ;;  %v353_v34 = vsel %vm352_vm6, %v351_v28, %v270_v25 }
  0x6c   :  { %v306_v24 = vadd.f32 %v305_v18, %v304_v11 }
  0x6d   :  { %v325_v27 = vadd.f32 %v324_v19, %v323_v15  ;;  %v340_v21 = vrot.slane %v339_v20, 2 }
  0x6e   :  { %v307_v32 = vadd.f32 %v306_v24, %v290_v23 }
  0x6f   :  { %v326_v30 = vrot.slane %v325_v27, 1  ;;  %v341_v31 = vadd.f32 %v340_v21, %v339_v20 }
  0x70   :  { %v355_v35 = vsel %vm354_vm7, %v353_v34, %v307_v32 }
  0x71   :  { %v327_v33 = vadd.f32 %v326_v30, %v325_v27  ;;  %v342_v3 = vrot.slane %v341_v31, 1 }
  0x73   :  { %v343_v26 = vadd.f32 %v342_v3, %v341_v31 }
  0x75   :  { %v344_v29 = vadd.f32 %v343_v26, %v327_v33 }
  0x77   :  { %v357_v37 = vsel %vm356_vm8, %v355_v35, %v344_v29 }
  0x78   :  { %358 = vst [vmem:[#allocation7] sm:$0xff] %v357_v37 }
  0x79   :  { %467 = shalt.err (!%p464_p6)
}
  0x7a   :  { %s468_s20 = scalar_lea.hbm %s649_s4, 128 }
  0x7b   :  { %p469_p7 = scmp.ne.s32.totalorder %s649_s4, %s468_s20  ;;  %p472_p8 = scmp.lt.u32.totalorder %s468_s20, %s649_s4 }
  0x7d   :  { %p474_p9 = pnand %p472_p8, %p469_p7 }
  0x7f   :  { %477 = shalt.err (!%p474_p9)
}
  0x80   :  { %368 = dma.vmem_to_hbm [thread:$0]  %s366_s2, 128, %s649_s4, [#allocation4]  }
  0x81   :  { %482 = dma.done.wait [#allocation4], 128  }
  0x82   :  { %483 = vsyncadd [#allocation4], 4294967168 }
  0x83   :  { %372 = vsyncpa [#allocation3], 1 }
  0x84   :  { %373 = vsyncpa [#allocation6], 1 }
  0x85   :  { %374 = vsyncpa [#allocation4], 1 }

</bundles_post_ra>
